<compile_context>
chip_gen: v5e
topology: v5e:2x2
jax: 0.10.0
libtpu: 0.0.40
codegen_flags: <defaults>
</compile_context>

<pallas_src>
import jax
import jax.numpy as jnp
from jax.experimental import pallas as pl
from jax.experimental.pallas import tpu as pltpu


# ---------------------------------------------------------------------------
# Fused multi-layer kernels (grid = (batch_tile, layer))
# ---------------------------------------------------------------------------
def _fused_cond_kernel(x_ref, cond_ref, w_ref, b_ref, wgb_ref, bgb_ref,
                       o_ref, h_acc):
    """All layers of: h=relu(x@W+b); out = h*(1+gamma)+beta, gamma/beta from
    a single cond matmul.  Activation stays resident in VMEM scratch."""
    layer = pl.program_id(1)

    @pl.when(layer == 0)
    def _():
        h_acc[...] = x_ref[...]                       # fp32 activation init

    d = o_ref.shape[-1]

    # Main matmul: bf16 operands, fp32 accumulation on the MXU.
    h = jnp.dot(h_acc[...].astype(jnp.bfloat16), w_ref[...],
                preferred_element_type=jnp.float32) + b_ref[...]
    # One fused conditioning matmul -> [gamma | beta].
    gb = jnp.dot(cond_ref[...], wgb_ref[...],
                 preferred_element_type=jnp.float32) + bgb_ref[...]

    h = jnp.maximum(h, 0.0)                           # fp32 epilogue (v5e-safe)
    h_acc[...] = h * (1.0 + gb[:, :d]) + gb[:, d:]

    @pl.when(layer == pl.num_programs(1) - 1)
    def _():
        o_ref[...] = h_acc[...]


def _fused_dense_kernel(x_ref, w_ref, b_ref, o_ref, h_acc):
    """Unconditional path (cond1 is None and cond2 is None): relu(x@W+b)."""
    layer = pl.program_id(1)

    @pl.when(layer == 0)
    def _():
        h_acc[...] = x_ref[...]

    h = jnp.dot(h_acc[...].astype(jnp.bfloat16), w_ref[...],
                preferred_element_type=jnp.float32) + b_ref[...]
    h_acc[...] = jnp.maximum(h, 0.0)

    @pl.when(layer == pl.num_programs(1) - 1)
    def _():
        o_ref[...] = h_acc[...]


# ---------------------------------------------------------------------------
# pallas_call wrappers
# ---------------------------------------------------------------------------
_VMEM_LIMIT = 32 * 1024 * 1024  # safe on v5e/v6e (128 MiB) and v7x (64 MiB)


def fused_cond_forward(x, cond, params, *, tm=8):
    B, D = x.shape
    Ct = cond.shape[1]
    L = params["w"].shape[0]
    assert B % tm == 0, "batch must be a multiple of the batch tile"

    flops = L * B * (2 * D * D + 2 * Ct * 2 * D) + 4 * L * B * D
    bytes_accessed = int(
        x.size * 4 + cond.size * 2 + B * D * 4
        + params["w"].size * 2 + params["b"].size * 4
        + params["wgb"].size * 2 + params["bgb"].size * 4)

    return pl.pallas_call(
        _fused_cond_kernel,
        out_shape=jax.ShapeDtypeStruct((B, D), jnp.float32),
        grid_spec=pltpu.PrefetchScalarGridSpec(
            num_scalar_prefetch=0,
            grid=(B // tm, L),
            in_specs=[
                pl.BlockSpec((tm, D), lambda b, l: (b, 0)),          # x
                pl.BlockSpec((tm, Ct), lambda b, l: (b, 0)),         # cond (bf16)
                pl.BlockSpec((None, D, D), lambda b, l: (l, 0, 0)),  # W  [L,D,D]
                pl.BlockSpec((None, 1, D), lambda b, l: (l, 0, 0)),  # b  [L,1,D]
                pl.BlockSpec((None, Ct, 2 * D), lambda b, l: (l, 0, 0)),  # Wg|Wb
                pl.BlockSpec((None, 1, 2 * D), lambda b, l: (l, 0, 0)),   # bg|bb
            ],
            out_specs=pl.BlockSpec((tm, D), lambda b, l: (b, 0)),
            scratch_shapes=[pltpu.VMEM((tm, D), jnp.float32)],       # resident act
        ),
        compiler_params=pltpu.CompilerParams(
            dimension_semantics=("parallel", "arbitrary"),
            vmem_limit_bytes=_VMEM_LIMIT,
        ),
        cost_estimate=pl.CostEstimate(flops=flops, transcendentals=0,
                                      bytes_accessed=bytes_accessed),
    )(x, cond, params["w"], params["b"], params["wgb"], params["bgb"])


def fused_dense_forward(x, params, *, tm=8):
    B, D = x.shape
    L = params["w"].shape[0]
    assert B % tm == 0, "batch must be a multiple of the batch tile"

    flops = L * B * 2 * D * D + L * B * D
    bytes_accessed = int(x.size * 4 + B * D * 4
                         + params["w"].size * 2 + params["b"].size * 4)

    return pl.pallas_call(
        _fused_dense_kernel,
        out_shape=jax.ShapeDtypeStruct((B, D), jnp.float32),
        grid_spec=pltpu.PrefetchScalarGridSpec(
            num_scalar_prefetch=0,
            grid=(B // tm, L),
            in_specs=[
                pl.BlockSpec((tm, D), lambda b, l: (b, 0)),
                pl.BlockSpec((None, D, D), lambda b, l: (l, 0, 0)),
                pl.BlockSpec((None, 1, D), lambda b, l: (l, 0, 0)),
            ],
            out_specs=pl.BlockSpec((tm, D), lambda b, l: (b, 0)),
            scratch_shapes=[pltpu.VMEM((tm, D), jnp.float32)],
        ),
        compiler_params=pltpu.CompilerParams(
            dimension_semantics=("parallel", "arbitrary"),
            vmem_limit_bytes=_VMEM_LIMIT,
        ),
        cost_estimate=pl.CostEstimate(flops=flops, transcendentals=0,
                                      bytes_accessed=bytes_accessed),
    )(x, params["w"], params["b"])


# ---------------------------------------------------------------------------
# CondSequential (mirrors ScriptableCondSequential.forward semantics:
# every layer receives (x, cond1, cond2); conds are Optional)
# ---------------------------------------------------------------------------
class CondSequential:
    def __init__(self, params, c1_dim, c2_dim, tm=8):
        self.params = params          # stacked [L, ...] FiLM-dense parameters
        self.c1_dim = c1_dim
        self.c2_dim = c2_dim
        self.tm = tm

    def __call__(self, x, cond1=None, cond2=None):
        if cond1 is None and cond2 is None:
            # No conditioning supplied -> plain dense stack.
            return fused_dense_forward(x, self.params, tm=self.tm)
        B = x.shape[0]
        c1 = cond1 if cond1 is not None else jnp.zeros((B, self.c1_dim), jnp.float32)
        c2 = cond2 if cond2 is not None else jnp.zeros((B, self.c2_dim), jnp.float32)
        cond = jnp.concatenate([c1, c2], axis=-1).astype(jnp.bfloat16)
        return fused_cond_forward(x, cond, self.params, tm=self.tm)


# ---------------------------------------------------------------------------
# Deterministic parameter init + pure-JAX reference (same dtypes as kernel)
# ---------------------------------------------------------------------------
def init_params(key, n_layers, d, c_total):
    ks = jax.random.split(key, 4)
    s = 0.1
    w = s * jax.random.normal(ks[0], (n_layers, d, d), jnp.float32)
    b = s * jax.random.normal(ks[1], (n_layers, 1, d), jnp.float32)
    wgb = s * jax.random.normal(ks[2], (n_layers, c_total, 2 * d), jnp.float32)
    bgb = s * jax.random.normal(ks[3], (n_layers, 1, 2 * d), jnp.float32)
    return {"w": w.astype(jnp.bfloat16), "b": b,
            "wgb": wgb.astype(jnp.bfloat16), "bgb": bgb}


def ref_forward(x, cond, params):
    h = x
    L = params["w"].shape[0]
    for l in range(L):
        pre = jnp.dot(h.astype(jnp.bfloat16), params["w"][l],
                      preferred_element_type=jnp.float32) + params["b"][l]
        pre = jnp.maximum(pre, 0.0)
        if cond is None:
            h = pre
        else:
            gb = jnp.dot(cond.astype(jnp.bfloat16), params["wgb"][l],
                         preferred_element_type=jnp.float32) + params["bgb"][l]
            d = pre.shape[-1]
            h = pre * (1.0 + gb[:, :d]) + gb[:, d:]
    return h


if __name__ == "__main__":
    key = jax.random.PRNGKey(0)
    B, D = 16, 128            # batch, hidden (lane-dense = 128)
    C1, C2 = 16, 16           # two conditioning streams
    n_layers = 3
    TM = 8                    # batch tile (sublane-aligned)

    kx, k1, k2, kp = jax.random.split(key, 4)
    x = jax.random.normal(kx, (B, D), jnp.float32)
    cond1 = jax.random.normal(k1, (B, C1), jnp.float32)
    cond2 = jax.random.normal(k2, (B, C2), jnp.float32)
    params = init_params(kp, n_layers, D, C1 + C2)

    model = CondSequential(params, C1, C2, tm=TM)

    # Conditional path (both conds present, like forward(x, cond1, cond2)).
    out = jax.block_until_ready(model(x, cond1, cond2))
    ref = ref_forward(x, jnp.concatenate([cond1, cond2], -1), params)
    assert out.shape == (B, D)
    assert jnp.allclose(out, ref, atol=2e-2, rtol=2e-2)

    # Partially-conditioned path (cond2 is None -> treated as zeros).
    out_c1 = jax.block_until_ready(model(x, cond1, None))
    ref_c1 = ref_forward(
        x, jnp.concatenate([cond1, jnp.zeros((B, C2), jnp.float32)], -1), params)
    assert jnp.allclose(out_c1, ref_c1, atol=2e-2, rtol=2e-2)

    # Unconditional path (both conds None).
    out_nc = jax.block_until_ready(model(x, None, None))
    ref_nc = ref_forward(x, None, params)
    assert jnp.allclose(out_nc, ref_nc, atol=2e-2, rtol=2e-2)

    print("KERNEL_OK")
</pallas_src>

<mosaic_0001>
module attributes {stable_mosaic.version = 11 : i64} {
  func.func @_fused_cond_kernel(%arg0: i32, %arg1: i32, %arg2: memref<8x128xf32, #tpu.memory_space<vmem>>, %arg3: memref<8x32xbf16, #tpu.memory_space<vmem>>, %arg4: memref<1x128x128xbf16, #tpu.memory_space<vmem>>, %arg5: memref<1x1x128xf32, #tpu.memory_space<vmem>>, %arg6: memref<1x32x256xbf16, #tpu.memory_space<vmem>>, %arg7: memref<1x1x256xf32, #tpu.memory_space<vmem>>, %arg8: memref<8x128xf32, #tpu.memory_space<vmem>>, %arg9: memref<8x128xf32, #tpu.memory_space<vmem>>) attributes {dimension_semantics = [#tpu.dimension_semantics<parallel>, #tpu.dimension_semantics<arbitrary>], iteration_bounds = array<i64: 2, 3>, scalar_prefetch = 0 : i64, scratch_operands = 1 : i64, tpu.core_type = #tpu.core_type<tc>, window_params = [{transform_indices = @transform_0, window_bounds = array<i64: 8, 128>}, {transform_indices = @transform_1, window_bounds = array<i64: 8, 32>}, {transform_indices = @transform_2, window_bounds = array<i64: 1, 128, 128>}, {transform_indices = @transform_3, window_bounds = array<i64: 1, 1, 128>}, {transform_indices = @transform_4, window_bounds = array<i64: 1, 32, 256>}, {transform_indices = @transform_5, window_bounds = array<i64: 1, 1, 256>}, {transform_indices = @transform_6, window_bounds = array<i64: 8, 128>}]} {
    %c0_i32 = arith.constant 0 : i32
    %0 = arith.cmpi eq, %arg1, %c0_i32 : i32
    %1 = arith.extui %0 : i1 to i32
    %c0_i32_0 = arith.constant 0 : i32
    %2 = arith.cmpi ne, %1, %c0_i32_0 : i32
    scf.if %2 {
      %c0_22 = arith.constant 0 : index
      %c0_23 = arith.constant 0 : index
      %32 = vector.load %arg2[%c0_22, %c0_23] : memref<8x128xf32, #tpu.memory_space<vmem>>, vector<8x128xf32>
      %c0_24 = arith.constant 0 : index
      %c0_25 = arith.constant 0 : index
      %33 = vector.load %arg9[%c0_24, %c0_25] : memref<8x128xf32, #tpu.memory_space<vmem>>, vector<8x128xf32>
      tpu.vector_store %arg9[%c0_24, %c0_25], %32 {strides = array<i32>} : memref<8x128xf32, #tpu.memory_space<vmem>>, vector<8x128xf32>,
    } else {
    }
    %c0 = arith.constant 0 : index
    %c0_1 = arith.constant 0 : index
    %3 = vector.load %arg9[%c0, %c0_1] : memref<8x128xf32, #tpu.memory_space<vmem>>, vector<8x128xf32>
    %4 = arith.truncf %3 : vector<8x128xf32> to vector<8x128xbf16>
    %c0_2 = arith.constant 0 : index
    %c0_3 = arith.constant 0 : index
    %c0_4 = arith.constant 0 : index
    %5 = vector.load %arg4[%c0_2, %c0_3, %c0_4] : memref<1x128x128xbf16, #tpu.memory_space<vmem>>, vector<1x128x128xbf16>
    %6 = vector.shape_cast %5 : vector<1x128x128xbf16> to vector<128x128xbf16>
    %cst = arith.constant dense<0.000000e+00> : vector<8x128xf32>
    %7 = tpu.matmul %4, %6, %cst {dimension_numbers = #tpu.dot_dimension_numbers<[1], [0], [0], [1], [0, 0, 1, 1], [], []>} : vector<8x128xbf16>, vector<128x128xbf16>, vector<8x128xf32> -> vector<8x128xf32>
    %c0_5 = arith.constant 0 : index
    %c0_6 = arith.constant 0 : index
    %c0_7 = arith.constant 0 : index
    %8 = vector.load %arg5[%c0_5, %c0_6, %c0_7] : memref<1x1x128xf32, #tpu.memory_space<vmem>>, vector<1x1x128xf32>
    %9 = vector.shape_cast %8 : vector<1x1x128xf32> to vector<1x128xf32>
    %10 = vector.broadcast %9 : vector<1x128xf32> to vector<8x128xf32>
    %11 = arith.addf %7, %10 : vector<8x128xf32>
    %c0_8 = arith.constant 0 : index
    %c0_9 = arith.constant 0 : index
    %12 = vector.load %arg3[%c0_8, %c0_9] : memref<8x32xbf16, #tpu.memory_space<vmem>>, vector<8x32xbf16>
    %c0_10 = arith.constant 0 : index
    %c0_11 = arith.constant 0 : index
    %c0_12 = arith.constant 0 : index
    %13 = vector.load %arg6[%c0_10, %c0_11, %c0_12] : memref<1x32x256xbf16, #tpu.memory_space<vmem>>, vector<1x32x256xbf16>
    %14 = vector.shape_cast %13 : vector<1x32x256xbf16> to vector<32x256xbf16>
    %cst_13 = arith.constant dense<0.000000e+00> : vector<8x256xf32>
    %15 = tpu.matmul %12, %14, %cst_13 {dimension_numbers = #tpu.dot_dimension_numbers<[1], [0], [0], [1], [0, 0, 1, 1], [], []>} : vector<8x32xbf16>, vector<32x256xbf16>, vector<8x256xf32> -> vector<8x256xf32>
    %c0_14 = arith.constant 0 : index
    %c0_15 = arith.constant 0 : index
    %c0_16 = arith.constant 0 : index
    %16 = vector.load %arg7[%c0_14, %c0_15, %c0_16] : memref<1x1x256xf32, #tpu.memory_space<vmem>>, vector<1x1x256xf32>
    %17 = vector.shape_cast %16 : vector<1x1x256xf32> to vector<1x256xf32>
    %18 = vector.broadcast %17 : vector<1x256xf32> to vector<8x256xf32>
    %19 = arith.addf %15, %18 : vector<8x256xf32>
    %cst_17 = arith.constant 0.000000e+00 : f32
    %20 = vector.broadcast %cst_17 : f32 to vector<8x128xf32>
    %21 = arith.maximumf %11, %20 : vector<8x128xf32>
    %22 = vector.extract_strided_slice %19 {offsets = [0, 0], sizes = [8, 128], strides = [1, 1]} : vector<8x256xf32> to vector<8x128xf32>
    %cst_18 = arith.constant 1.000000e+00 : f32
    %23 = vector.broadcast %cst_18 : f32 to vector<8x128xf32>
    %24 = arith.addf %23, %22 : vector<8x128xf32>
    %25 = arith.mulf %21, %24 : vector<8x128xf32>
    %26 = vector.extract_strided_slice %19 {offsets = [0, 128], sizes = [8, 128], strides = [1, 1]} : vector<8x256xf32> to vector<8x128xf32>
    %27 = arith.addf %25, %26 : vector<8x128xf32>
    %c0_19 = arith.constant 0 : index
    %c0_20 = arith.constant 0 : index
    %28 = vector.load %arg9[%c0_19, %c0_20] : memref<8x128xf32, #tpu.memory_space<vmem>>, vector<8x128xf32>
    tpu.vector_store %arg9[%c0_19, %c0_20], %27 {strides = array<i32>} : memref<8x128xf32, #tpu.memory_space<vmem>>, vector<8x128xf32>,
    %c2_i32 = arith.constant 2 : i32
    %29 = arith.cmpi eq, %arg1, %c2_i32 : i32
    %30 = arith.extui %29 : i1 to i32
    %c0_i32_21 = arith.constant 0 : i32
    %31 = arith.cmpi ne, %30, %c0_i32_21 : i32
    scf.if %31 {
      %c0_22 = arith.constant 0 : index
      %c0_23 = arith.constant 0 : index
      %32 = vector.load %arg9[%c0_22, %c0_23] : memref<8x128xf32, #tpu.memory_space<vmem>>, vector<8x128xf32>
      %c0_24 = arith.constant 0 : index
      %c0_25 = arith.constant 0 : index
      %33 = vector.load %arg8[%c0_24, %c0_25] : memref<8x128xf32, #tpu.memory_space<vmem>>, vector<8x128xf32>
      tpu.vector_store %arg8[%c0_24, %c0_25], %32 {strides = array<i32>} : memref<8x128xf32, #tpu.memory_space<vmem>>, vector<8x128xf32>,
    } else {
    }
    return
  }
  func.func @transform_0(%arg0: i32, %arg1: i32) -> (i32, i32) {
    %c0_i32 = arith.constant 0 : i32
    %c0_i32_0 = arith.constant 0 : i32
    return %arg0, %c0_i32 : i32, i32
  }
  func.func @transform_1(%arg0: i32, %arg1: i32) -> (i32, i32) {
    %c0_i32 = arith.constant 0 : i32
    %c0_i32_0 = arith.constant 0 : i32
    return %arg0, %c0_i32 : i32, i32
  }
  func.func @transform_2(%arg0: i32, %arg1: i32) -> (i32, i32, i32) {
    %c0_i32 = arith.constant 0 : i32
    %c0_i32_0 = arith.constant 0 : i32
    %c0_i32_1 = arith.constant 0 : i32
    return %arg1, %c0_i32, %c0_i32_0 : i32, i32, i32
  }
  func.func @transform_3(%arg0: i32, %arg1: i32) -> (i32, i32, i32) {
    %c0_i32 = arith.constant 0 : i32
    %c0_i32_0 = arith.constant 0 : i32
    %c0_i32_1 = arith.constant 0 : i32
    return %arg1, %c0_i32, %c0_i32_0 : i32, i32, i32
  }
  func.func @transform_4(%arg0: i32, %arg1: i32) -> (i32, i32, i32) {
    %c0_i32 = arith.constant 0 : i32
    %c0_i32_0 = arith.constant 0 : i32
    %c0_i32_1 = arith.constant 0 : i32
    return %arg1, %c0_i32, %c0_i32_0 : i32, i32, i32
  }
  func.func @transform_5(%arg0: i32, %arg1: i32) -> (i32, i32, i32) {
    %c0_i32 = arith.constant 0 : i32
    %c0_i32_0 = arith.constant 0 : i32
    %c0_i32_1 = arith.constant 0 : i32
    return %arg1, %c0_i32, %c0_i32_0 : i32, i32, i32
  }
  func.func @transform_6(%arg0: i32, %arg1: i32) -> (i32, i32) {
    %c0_i32 = arith.constant 0 : i32
    %c0_i32_0 = arith.constant 0 : i32
    return %arg0, %c0_i32 : i32, i32
  }
}

</mosaic_0001>

<bundles_post_ra>
// kernel: tpu_custom_call.1
= control target key start
LH: loop header
LB: loop body
LE: loop exit
PB: predicated region body
PF: predicated region fallthrough
CT: control target
= control target key end

     0   :  { %s1741_s0 = inlined_call_operand.hbm [shape: f32[16,128], index: 0, kind: input, shape index: {}]   ;;  %s1742_s1 = inlined_call_operand.hbm [shape: bf16[16,32], index: 1, kind: input, shape index: {}]   ;;  %s1743_s2 = inlined_call_operand.hbm [shape: bf16[3,128,128], index: 2, kind: input, shape index: {}]   ;;  %s1744_s3 = inlined_call_operand.hbm [shape: f32[3,1,128], index: 3, kind: input, shape index: {}]   ;;  %s1745_s4 = inlined_call_operand.hbm [shape: bf16[3,32,256], index: 4, kind: input, shape index: {}]   ;;  %s1746_s5 = inlined_call_operand.hbm [shape: f32[3,1,256], index: 5, kind: input, shape index: {}]   ;;  %s1747_s6 = inlined_call_operand.hbm [shape: f32[16,128], index: 6, kind: output, shape index: {}]  }
   0x1   :  { %1760 = sst [smem:[#allocation34_spill]] %s1741_s0 }
   0x2   :  { %1761 = sst [smem:[#allocation35_spill]] %s1742_s1 }
   0x3   :  { %1762 = sst [smem:[#allocation36_spill]] %s1744_s3 }
   0x4   :  { %1763 = sst [smem:[#allocation37_spill]] %s1747_s6 }
   0x5   :  { %11 = vsyncpa [#allocation4], 0 }
   0x6   :  { %13 = vsyncpa [#allocation4 + $0x1], 0 }
   0x7   :  { %14 = vsyncpa [#allocation7], 0 }
   0x8   :  { %16 = vsyncpa [#allocation7 + $0x1], 0 }
   0x9   :  { %17 = vsyncpa [#allocation10], 0 }
   0xa   :  { %19 = vsyncpa [#allocation10 + $0x1], 0 }
   0xb   :  { %20 = vsyncpa [#allocation13], 0 }
   0xc   :  { %22 = vsyncpa [#allocation13 + $0x1], 0 }
   0xd   :  { %23 = vsyncpa [#allocation5], 0 }
   0xe   :  { %25 = vsyncpa [#allocation5 + $0x1], 0  ;;  %s1420_s21 = smov 0   ;;  %s1422_s22 = smov 0  }
   0xf   :  { %s1424_s23 = smov 0   ;;  %s1426_s24 = smov 0  }
  0x10   :  { %s1428_s25 = smov 0   ;;  %s1430_s26 = smov 0  }
  0x11   :  { %s1432_s27 = smov 0   ;;  %s1434_s28 = smov 0  }
  0x12   :  { %s1436_s29 = smov 0   ;;  %s1438_s30 = smov 0  }
  0x13   :  { %s1440_s7 = smov 0  }
  0x14 LB: > { %1764 = sst [smem:[#allocation21_spill]] %s1343_s22  ;;  %s1474_s8 = sadd.s32 4294967295, %s1379_s7   ;;  %s1379_s7 = sphi %s1440_s7, %s31_s7   ;;  %s1375_s30 = sphi %s1438_s30, %s1809_s30   ;;  %s1371_s29 = sphi %s1436_s29, %s1814_s29   ;;  %s1367_s28 = sphi %s1434_s28, %s1807_s28   ;;  %s1363_s27 = sphi %s1432_s27, %s1813_s27   ;;  %s1359_s26 = sphi %s1430_s26, %s1812_s26   ;;  %s1355_s25 = sphi %s1428_s25, %s1811_s25   ;;  %s1351_s24 = sphi %s1426_s24, %s1810_s24   ;;  %s1347_s23 = sphi %s1424_s23, %s1805_s23   ;;  %s1343_s22 = sphi %s1422_s22, %s1804_s22   ;;  %s1339_s21 = sphi %s1420_s21, %s1803_s21  }
  0x15   : > { %1765 = sst [smem:[#allocation22_spill]] %s1347_s23  ;;  %s837_s9 = sadd.s32 4294967294, %s1379_s7  }
  0x16   : > { %1766 = sst [smem:[#allocation23_spill]] %s1351_s24  ;;  %p57_p0 = scmp.ne.s32.totalorder %s1359_s26, %s1355_s25 }
  0x17   : > { %1767 = sst [smem:[#allocation24_spill]] %s1363_s27  ;;  %p58_p1 = scmp.eq.s32.totalorder %s1379_s7, 0 }
  0x18   : > { %1768 = sst [smem:[#allocation25_spill]] %s1367_s28  ;;  %p63_p2 = scmp.ne.s32.totalorder %s1355_s25, %s1351_s24 }
  0x19   : > { %1769 = sst [smem:[#allocation26_spill]] %s1375_s30  ;;  %p64_p3 = scmp.eq.s32.totalorder %s1474_s8, 0 }
  0x1a   : > { %p1488_p4 = por %p58_p1, %p57_p0  ;;  %p109_p6 = scmp.ne.s32.totalorder %s1347_s23, %s1343_s22 }
  0x1b   : > { %p1493_p5 = por %p64_p3, %p63_p2  ;;  %p115_p7 = scmp.ne.s32.totalorder %s1343_s22, %s1339_s21 }
  0x1c   : > { %p217_p8 = scmp.eq.s32.totalorder %s1474_s8, 5  ;;  %p1501_p9 = por %p109_p6, %p58_p1 }
  0x1d   : > { %p223_p10 = scmp.eq.s32.totalorder %s837_s9, 5  ;;  %p1505_p11 = por %p115_p7, %p64_p3 }
  0x1e   : > { %p1512_p12 = por %p217_p8, %p57_p0  ;;  %p966_p1 = scmp.lt.s32.totalorder %s1379_s7, 6 }
  0x1f   : > { %s1773_s16 = scalar_select %p1505_p11, 1, 0 }
  0x20   : > { %s1775_s17 = scalar_select %p1512_p12, 1, 0 }
  0x21   : > { %1774 = sst [smem:[#allocation27_spill]] %s1773_s16  ;;  %p1516_p13 = por %p223_p10, %p63_p2 }
  0x22   : > { %1776 = sst [smem:[#allocation28_spill]] %s1775_s17  ;;  %s1522_s19 = sand.u32 1, %s1359_s26  }
  0x23   : > { %s1777_s18 = scalar_select %p1516_p13, 1, 0 }
  0x24   : > { %s842_s21 = sshll.u32 %s1522_s19, 2  ;;  %p1530_p0 = pnand %p966_p1, %p1488_p4 }
  0x25   : > { %1778 = sst [smem:[#allocation29_spill]] %s1777_s18  ;;  %s843_s11 = sshll.u32 %s1375_s30, 2 }
  0x26   : > { %s1780_s1 = sld [smem:[#allocation35_spill]]  ;;  %s266_s20 = scalar_lea.vmem [#allocation6], %s842_s21 }
  0x27   : > { %s274_s6 = sshll.u32 %s266_s20, 4  ;;  %s1781_s12 = sand.u32 1, %s1379_s7   ;;  %s275_s6 = int_to_ptr.vmem [resolvable:$true] %s274_s6 }
  0x28   : > { %s1540_s17 = scalar_lea.sflag [#allocation7], %s1781_s12  ;;  %p1549_p2 = pnand %p966_p1, %p1501_p9 }
  0x29   : > { %p852_p3 = scmp.ge.s32.totalorder %s1379_s7, 1  ;;  %p359_p4 = scmp.lt.s32.totalorder %s1379_s7, 7 }
  0x2a   : > { %s40_s13 = sadd.s32 1, %s1371_s29  ;;  %s1786_s3 = sld [smem:[#allocation36_spill]] }
  0x2b   : > { %p1555_p6 = pnand %p852_p3, %p359_p4  ;;  %p41_p7 = scmp.ge.s32.totalorder %s40_s13, 3 }
  0x2c   : > { %s270_s18 = scalar_lea.hbm %s1780_s1, %s843_s11  ;;  %s1788_s27 = sadd.s32 1, %s1347_s23 }
  0x2d   : > { %s272_s24 = sshll.u32 %s270_s18, 4  ;;  %s1561_s18 = sand.u32 1, %s1347_s23   ;;  %s273_s24 = int_to_ptr.hbm [resolvable:$true] %s272_s24 }
  0x2e   : > { %949 = dma.hbm_to_vmem [thread:$0]  (!%p1530_p0), %s273_s24, 64, %s275_s6, %s1540_s17  }
  0x2f   : > { %s1816_s13 = smov (%p41_p7, %s40_s13), 0  ;;  %s1785_s6 = sadd.s32 1, %s1375_s30 }
  0x30   : > { %1784 = sst [smem:[#allocation30_spill]] %s1816_s13  ;;  %s1818_s6 = smov (!%p41_p7, %s1785_s6), %s1375_s30 }
  0x31   : > { %s99_s24 = ssub.s32 %s1371_s29, %s1816_s13  ;;  %s309_s21 = scalar_lea.hbm %s1786_s3, %s1371_s29 }
  0x32   : > { %p45_p8 = scmp.ge.s32.totalorder %s1818_s6, 2  ;;  %p100_p9 = scmp.eq.s32.totalorder %s99_s24, 0 }
  0x33   : > { %s311_s12 = sshll.u32 %s309_s21, 4  ;;  %s306_s1 = scalar_lea.vmem [#allocation9], %s1561_s18  ;;  %s312_s12 = int_to_ptr.hbm [resolvable:$true] %s311_s12 }
  0x34   : > { %s313_s28 = sshll.u32 %s306_s1, 4  ;;  %s1820_s6 = smov (%p45_p8, %s1818_s6), 0  ;;  %s314_s28 = int_to_ptr.vmem [resolvable:$true] %s313_s28 }
  0x35   : > { %1787 = sst [smem:[#allocation31_spill]] %s1820_s6  ;;  %s47_s22 = ssub.s32 %s1375_s30, %s1820_s6 }
  0x36   : > { %s1580_s16 = scalar_select %p100_p9, %s1347_s23, %s1788_s27  }
  0x37   : > { %p48_p10 = scmp.eq.s32.totalorder %s47_s22, 0  ;;  %s1790_s15 = sand.u32 1, %s1379_s7  }
  0x38   : > { %1789 = sst [smem:[#allocation32_spill]] %s1580_s16  ;;  %s1586_s20 = scalar_lea.sflag [#allocation10], %s1790_s15 }
  0x39   : > { %955 = dma.hbm_to_vmem [thread:$0]  (!%p1549_p2), %s312_s12, 16, %s314_s28, %s1586_s20  }
  0x3a   : > { %s1791_s1 = sadd.s32 1, %s1359_s26  ;;  %s840_s21 = sshll.u32 %s1522_s19, 3 }
  0x3b   : > { %s1594_s24 = scalar_select %p48_p10, %s1359_s26, %s1791_s1  }
  0x3c   : > { %s841_s27 = sshll.u32 %s1375_s30, 3  ;;  %s1793_s0 = sld [smem:[#allocation34_spill]] }
  0x3d   : > { %1792 = sst [smem:[#allocation33_spill]] %s1594_s24  ;;  %s247_s16 = scalar_lea.vmem [#allocation3], %s840_s21 }
  0x3e   : > { %s255_s22 = sshll.u32 %s247_s16, 4  ;;  %s844_s15 = sshll.u32 %s1561_s18, 6  ;;  %s256_s22 = int_to_ptr.vmem [resolvable:$true] %s255_s22 }
  0x3f   : > { %s244_s28 = scalar_lea.sflag [#allocation4], %s1522_s19  ;;  %s915_s12 = sshll.u32 %s1371_s29, 6 }
  0x40   : > { %s290_s24 = scalar_lea.hbm %s1743_s2, %s915_s12  ;;  %s285_s3 = scalar_lea.vmem [#allocation8], %s844_s15 }
  0x41   : > { %s293_s13 = sshll.u32 %s285_s3, 4  ;;  %s847_s16 = sshll.u32 %s1561_s18, 5  ;;  %s294_s13 = int_to_ptr.vmem [resolvable:$true] %s293_s13 }
  0x42   : > { %s251_s6 = scalar_lea.hbm %s1793_s0, %s841_s27  ;;  %s291_s27 = sshll.u32 %s290_s24, 4  ;;  %s292_s27 = int_to_ptr.hbm [resolvable:$true] %s291_s27 }
  0x43   : > { %s253_s23 = sshll.u32 %s251_s6, 4  ;;  %s1381_s6 = smov 64   ;;  %s254_s23 = int_to_ptr.hbm [resolvable:$true] %s253_s23 }
  0x44   : > { %946 = dma.hbm_to_vmem [thread:$0]  (!%p1530_p0), %s254_s23, 128, %s256_s22, %s244_s28  }
  0x45   : > { %s1382_s21 = smov 4   ;;  %s916_s23 = sshll.u32 %s1371_s29, 5 }
  0x46   : > { %952 = dma.hbm_to_vmem [thread:$0]  (!%p1549_p2), %s292_s27, 1024, %s294_s13, %s1540_s17, %s1381_s6, %s1381_s6, %s1382_s21  }
  0x47   : > { %s329_s30 = scalar_lea.hbm %s1745_s4, %s916_s23  ;;  %s324_s22 = scalar_lea.vmem [#allocation11], %s847_s16 }
  0x48   : > { %s332_s15 = sshll.u32 %s324_s22, 4  ;;  %s330_s24 = sshll.u32 %s329_s30, 4  ;;  %s333_s15 = int_to_ptr.vmem [resolvable:$true] %s332_s15  ;;  %s331_s24 = int_to_ptr.hbm [resolvable:$true] %s330_s24 }
  0x49   : > { %s1383_s28 = smov 128   ;;  %s1384_s12 = smov 8  }
  0x4a   : > { %958 = dma.hbm_to_vmem [thread:$0]  (!%p1549_p2), %s331_s24, 512, %s333_s15, %s1586_s20, %s1383_s28, %s1383_s28, %s1384_s12  }
  0x4b   : > { %s850_s1 = sshll.u32 %s1561_s18, 1  ;;  %s851_s3 = sshll.u32 %s1371_s29, 1 }
  0x4c   : > { %s350_s13 = scalar_lea.hbm %s1746_s5, %s851_s3  ;;  %s346_s6 = scalar_lea.vmem [#allocation12], %s850_s1 }
  0x4d   : > { %s352_s27 = sshll.u32 %s350_s13, 4  ;;  %s354_s21 = sshll.u32 %s346_s6, 4  ;;  %s353_s27 = int_to_ptr.hbm [resolvable:$true] %s352_s27  ;;  %s355_s21 = int_to_ptr.vmem [resolvable:$true] %s354_s21 }
  0x4e   : > { %s343_s16 = scalar_lea.sflag [#allocation13], %s1561_s18  ;;  %363 = sbr.rel (%p1555_p6) target bundleno = 314 (0x13a), region = 44 }
  0x4f   : > { %961 = dma.hbm_to_vmem [thread:$0]  (!%p1549_p2), %s353_s27, 32, %s355_s21, %s343_s16  }
  0x50   : > { %s1631_s20 = sand.u32 (!%p1555_p6), 1, %s1355_s25  }
  0x51   : > { %s853_s23 = sshll.u32 (!%p1555_p6), %s1631_s20, 3  ;;  %s366_s0 = scalar_lea.sflag (!%p1555_p6), [#allocation4], %s1631_s20 }
  0x52   : > { %s369_s19 = scalar_lea.vmem (!%p1555_p6), [#allocation3], %s853_s23 }
  0x53   : > { %1314 = dma.done.wait (%p1493_p5), %s366_s0, 128  }
  0x54   : > { %1316 = vsyncadd (%p1493_p5), %s366_s0, 4294967168  ;;  %s375_s10 = sand.u32 1, %s1474_s8   ;;  %s854_s11 = sshll.u32 %s1631_s20, 2 }
  0x55   : > { %s376_s18 = scalar_lea.sflag [#allocation7], %s375_s10  ;;  %s1641_s9 = scalar_lea.vmem [#allocation6], %s854_s11 }
  0x56   : > { %1318 = dma.done.wait (%p1493_p5), %s376_s18, 64  }
  0x57   : > { %1320 = vsyncadd (%p1493_p5), %s376_s18, 4294967232  ;;  %s1794_s30 = sld [smem:[#allocation21_spill]] }
  0x5d   : > { %s1648_s15 = sand.u32 1, %s1794_s30  }
  0x5e   : > { %s855_s24 = sshll.u32 %s1648_s15, 6 }
  0x5f   : > { %s1651_s28 = scalar_lea.vmem [#allocation8], %s855_s24 }
  0x60   : > { %1322 = dma.done.wait (%p1505_p11), %s376_s18, 1024  }
  0x61   : > { %1324 = vsyncadd (%p1505_p11), %s376_s18, 4294966272  ;;  %s396_s8 = scalar_lea.sflag [#allocation10], %s375_s10  ;;  %s398_s12 = scalar_lea.vmem [#allocation9], %s1648_s15 }
  0x62   : > { %1326 = dma.done.wait (%p1505_p11), %s396_s8, 528  }
  0x63   : > { %1328 = vsyncadd (%p1505_p11), %s396_s8, 4294966768  ;;  %s856_s14 = sshll.u32 %s1648_s15, 5  ;;  %s857_s1 = sshll.u32 %s1648_s15, 1 }
  0x64   : > { %s408_s3 = scalar_lea.vmem [#allocation11], %s856_s14  ;;  %s415_s17 = scalar_lea.sflag [#allocation13], %s1648_s15 }
  0x65   : > { %s1665_s13 = scalar_lea.vmem [#allocation12], %s857_s1 }
  0x66   : > { %1330 = dma.done.wait (%p1505_p11), %s415_s17, 32  }
  0x67   : > { %1332 = vsyncadd (%p1505_p11), %s415_s17, 4294967264  ;;  %s1671_s27 = scalar_lea.vmem [#allocation14], %s853_s23  ;;  %s1796_s6 = sld [smem:[#allocation24_spill]] }
  0x6d   : > { %p859_p5 = scmp.ne.s32.totalorder %s1796_s6, 0 }
  0x6f   : > { %476 = sbr.rel (%p859_p5) target bundleno = 118 (0x76), region = 72 }
  0x74   : > { %v477_v0 = vld [vmem:[%s369_s19] sm:$0xff] }
  0x75   : > { %478 = vst [vmem:[#allocation2] sm:$0xff] %v477_v0 }
  0x76 PF: > { %v924_v1 = vld [vmem:[%s1651_s28 + $0x38] sm:$0xff]  ;;  %v923_v4 = vld [vmem:[%s1651_s28 + $0x30] sm:$0xff]  ;;  %v925_v6 = vld [vmem:[%s408_s3 + $0x4] sm:$0xf]  ;;  %vm593_vm0 = vcmask 261120   ;;  %s1797_s21 = sld [smem:[#allocation24_spill]] }
  0x77   : > { %v927_v2 = vld [vmem:[%s408_s3 + $0x14] sm:$0xf]  ;;  %v904_v3 = vld [vmem:[%s408_s3 + $0x18] sm:$0xf0]  ;;  %549 = vmatpush.bf16.msra.mxu0 %v924_v1  ;;  %v896_v7 = vld [vmem:[%s408_s3 + $0x8] sm:$0xf0] }
  0x78   : > { %v907_v5 = vor.u32 %v927_v2, %v904_v3  ;;  %v902_v8 = vld [vmem:[%s408_s3 + $0x10] sm:$0xf]  ;;  %v928_v9 = vld [vmem:[%s408_s3 + $0x14] sm:$0xf0]  ;;  %v899_v10 = vor.u32 %v925_v6, %v896_v7  ;;  %v894_v12 = vld [vmem:[%s408_s3] sm:$0xf] }
  0x79   : > { %v903_v11 = vor.u32 %v928_v9, %v902_v8  ;;  %v926_v13 = vld [vmem:[%s408_s3 + $0x4] sm:$0xf0]  ;;  %v562_v16 = vld [vmem:[%s1641_s9] sm:$0xf]  ;;  %v921_v17 = vld [vmem:[%s1651_s28 + $0x20] sm:$0xff] }
  0x7a   : > { %616 = vmatpush.bf16.msra.mxu2 %v907_v5  ;;  %v922_v14 = vld [vmem:[%s1651_s28 + $0x28] sm:$0xff]  ;;  %v895_v15 = vor.u32 %v926_v13, %v894_v12  ;;  %v920_v18 = vld [vmem:[%s1651_s28 + $0x18] sm:$0xff]  ;;  %v919_v19 = vld [vmem:[%s1651_s28 + $0x10] sm:$0xff] }
  0x7b   : > { %550 = vmatpush.bf16.msra.mxu0 %v923_v4  ;;  %603 = vmatpush.bf16.msra.mxu1 %v903_v11  ;;  %v918_v20 = vld [vmem:[%s1651_s28 + $0x8] sm:$0xff]  ;;  %v917_v21 = vld [vmem:[%s1651_s28] sm:$0xff] }
  0x7c   : > { %v479_v22 = vld [vmem:[#allocation2] sm:$0xff]  ;;  %p910_p11 = scmp.ne.s32.totalorder %s1797_s21, 2 }
  0x7d   : > { %v480_v23 = vpack.c.bf16 %v479_v22, %v479_v22  ;;  %v567_v27 = vld [vmem:[%s1665_s13] sm:$0x3]  ;;  %v1060_v31 = vld [vmem:[%s398_s12] ss:$0 sm:$0xff] }
  0x7e   : > { %617 = vmatpush.bf16.msra.mxu2 %v899_v10  ;;  %v569_v29 = vperm.slane %v567_v27, 0  ;;  %v570_v34 = vperm.slane %v567_v27, 1 }
  0x7f   : > { %551 = vmatpush.bf16.msra.mxu0 %v922_v14  ;;  %604 = vmatpush.bf16.msra.mxu1 %v895_v15 }
  0x81   : > { %909 = vmatmul.msk.bf16.vlgmr.msra.gmra.mxu2 %vm593_vm0, %v562_v16 }
  0x82   : > { %908 = vmatmul.msk.bf16.vlgmr.msra.gmra.mxu1 %vm593_vm0, %v562_v16 }
  0x83   : > { %552 = vmatpush.bf16.msra.mxu0 %v921_v17 }
  0x87   : > { %553 = vmatpush.bf16.msra.mxu0 %v920_v18 }
  0x8b   : > { %554 = vmatpush.bf16.msra.mxu0 %v919_v19 }
  0x8f   : > { %555 = vmatpush.bf16.msra.mxu0 %v918_v20 }
  0x93   : > { %556 = vmatpush.bf16.msra.mxu0 %v917_v21 }
  0x96   : > { %557 = vmatmul.bf16.vlgmr.msra.gmra.mxu0 %v480_v23 }
  0xff   : > { %v606_v24 = vpop.f32.mrf.mxu1 }
 0x100   : > { %v607_v30 = vadd.f32 %v606_v24, %v569_v29 }
 0x102   : > { %v624_v33 = vadd.f32 1.0, %v607_v30 }
 0x104   : > { %v619_v25 = vpop.f32.mrf.mxu2 }
 0x105   : > { %v620_v37 = vadd.f32 %v619_v25, %v570_v34 }
 0x107   : > { %v608_v26 = vpop.f32.mrf.mxu1 }
 0x10c   : > { %v621_v28 = vpop.f32.mrf.mxu2 }
 0x113   : > { %v558_v32 = vpop.f32.mrf.mxu0 }
 0x114   : > { %v559_v35 = vadd.f32 %v1060_v31, %v558_v32 }
 0x116   : > { %v623_v36 = vmax.f32 %v559_v35, 0.0 }
 0x118   : > { %v625_v38 = vmul.f32 %v624_v33, %v623_v36  ;;  %631 = sbr.rel (%p910_p11) target bundleno = 293 (0x125), region = 76 }
 0x11a   : > { %v626_v39 = vadd.f32 %v625_v38, %v620_v37 }
 0x11b   : > { %v560_v40 = vpop.f32.mrf.mxu0 }
 0x11c   : > { %627 = vst [vmem:[#allocation2] sm:$0xff] %v626_v39 }
 0x123   : > { %v632_v41 = vld [vmem:[#allocation2] sm:$0xff] }
 0x124   : > { %633 = vst [vmem:[%s1671_s27] sm:$0xff] %v632_v41 }
 0x125 PF: > { %s1798_s16 = sld [smem:[#allocation25_spill]]  ;;  %s647_s9 = sshll.u32 %s1671_s27, 4  ;;  %s648_s9 = int_to_ptr.vmem [resolvable:$true] %s647_s9 }
 0x126   : > { %s1800_s11 = sld [smem:[#allocation37_spill]]  ;;  %s635_s22 = scalar_lea.sflag [#allocation5], %s1631_s20 }
 0x12b   : > { %s912_s0 = sshll.u32 %s1798_s16, 3 }
 0x12c   : > { %s645_s18 = scalar_lea.hbm %s1800_s11, %s912_s0  ;;  %s1261_s12 = scalar_lea.hbm %s1800_s11, 16 }
 0x12d   : > { %s649_s30 = sshll.u32 %s645_s18, 4  ;;  %s650_s30 = int_to_ptr.hbm [resolvable:$true] %s649_s30 }
 0x12e   : > { %s1255_s15 = sshra.s32 %s650_s30, 4  ;;  %s1256_s15 = int_to_ptr.hbm [resolvable:$true] %s1255_s15 }
 0x12f   : > { %s1257_s24 = scalar_lea.hbm %s1256_s15, 8  ;;  %p1262_p3 = scmp.lt.s32.totalorder %s1256_s15, %s1800_s11 }
 0x130   : > { %p1258_p1 = scmp.ne.s32.totalorder %s1256_s15, %s1257_s24  ;;  %p1263_p4 = scmp.lt.s32.totalorder %s1261_s12, %s1257_s24 }
 0x132   : > { %p1259_p0 = pnand %p1258_p1, %p1512_p12  ;;  %p1264_p6 = por %p1263_p4, %p1262_p3 }
 0x134   : > { %p1260_p2 = pneg %p1259_p0 }
 0x136   : > { %p1265_p7 = pnand %p1264_p6, %p1260_p2 }
 0x138   : > { %1268 = shalt.err (!%p1265_p7)
}
 0x139   : > { %941 = dma.vmem_to_hbm [thread:$0]  (%p1512_p12), %s648_s9, 128, %s650_s30, %s635_s22  }
 0x13a PF: > { %s1801_s20 = sld [smem:[#allocation23_spill]]  ;;  %p967_p8 = scmp.ge.s32.totalorder %s1379_s7, 2 }
 0x13c   : > { %p963_p9 = pnand %p967_p8, %p1516_p13 }
 0x13e   : > { %p964_p10 = pneg %p963_p9 }
 0x140   : > { %s661_s17 = sand.u32 1, %s1801_s20  }
 0x141   : > { %s662_s13 = scalar_lea.sflag [#allocation5], %s661_s17 }
 0x142   : > { %1334 = dma.done.wait (%p964_p10), %s662_s13, 128  }
 0x143   : > { %1336 = vsyncadd (%p964_p10), %s662_s13, 4294967168  ;;  %s31_s7 = sadd.s32 1, %s1379_s7   ;;  %s1803_s21 = sld [smem:[#allocation21_spill]] }
 0x144   : > { %p28_p5 = scmp.ge.s32.totalorder %s31_s7, 8   ;;  %s1804_s22 = sld [smem:[#allocation22_spill]] }
 0x145   : > { %s1805_s23 = sld [smem:[#allocation32_spill]]  ;;  %s1810_s24 = smov %s1355_s25 }
 0x146   : > { %s1806_s27 = sld [smem:[#allocation33_spill]]  ;;  %s1811_s25 = smov %s1359_s26 }
 0x147   : > { %s1807_s28 = sld [smem:[#allocation26_spill]] }
 0x148   : > { %s1808_s6 = sld [smem:[#allocation30_spill]] }
 0x149   : > { %s1809_s30 = sld [smem:[#allocation31_spill]] }
 0x14a   :  { %30 = sbr.rel (!%p28_p5) target bundleno = 20 (0x14), region = 158 }
 0x14c   : > { %s1812_s26 = smov %s1806_s27  ;;  %s1813_s27 = smov %s1371_s29 }
 0x14e   : > { %s1814_s29 = smov %s1808_s6 }
 0x14f   :  { %668 = vsyncpa [#allocation4], 1 }
 0x150   :  { %670 = vsyncpa [#allocation4 + $0x1], 1 }
 0x151   :  { %671 = vsyncpa [#allocation7], 1 }
 0x152   :  { %673 = vsyncpa [#allocation7 + $0x1], 1 }
 0x153   :  { %674 = vsyncpa [#allocation10], 1 }
 0x154   :  { %676 = vsyncpa [#allocation10 + $0x1], 1 }
 0x155   :  { %677 = vsyncpa [#allocation13], 1 }
 0x156   :  { %679 = vsyncpa [#allocation13 + $0x1], 1 }
 0x157   :  { %680 = vsyncpa [#allocation5], 1 }
 0x158   :  { %682 = vsyncpa [#allocation5 + $0x1], 1 }

</bundles_post_ra>
